<compile_context>
chip_gen: v5e
topology: v5e:2x2
jax: 0.10.0
libtpu: 0.0.40
codegen_flags: <defaults>
</compile_context>

<pallas_src>
import jax
import jax.numpy as jnp
from jax import lax
from jax.experimental import pallas as pl
from jax.experimental.pallas import tpu as pltpu


# ----------------------------------------------------------------------------
# Kernels
# ----------------------------------------------------------------------------

def _critic(s_bf16, a_bf16, w1s, w1a, b1, w2, b2, w3, b3_scalar):
    """One SAC critic on an already-loaded (TB, *) tile.  Returns (1, TB) f32."""
    # Layer 1: fused concat  ->  [s | a] @ w1 == s @ w1_s + a @ w1_a
    h1 = jnp.dot(s_bf16, w1s, preferred_element_type=jnp.float32)
    h1 = h1 + jnp.dot(a_bf16, w1a, preferred_element_type=jnp.float32)
    h1 = jnp.maximum(h1 + b1, 0.0)                                   # f32 VPU

    # Layer 2: Linear + ReLU
    h2 = jnp.dot(h1.astype(jnp.bfloat16), w2,
                 preferred_element_type=jnp.float32)
    h2 = jnp.maximum(h2 + b2, 0.0)

    # Layer 3: contract w3 (1, H) against h2 (TB, H) on H -> (1, TB).
    # dimension_numbers ((1,),(1,)) is the trans_b MXU matmul (same lowering
    # as pl.dot(w3, h2, trans_b=True)); keeps the output row lane-dense so
    # stores are unmasked full-width vst.
    q = lax.dot_general(
        w3, h2.astype(jnp.bfloat16),
        dimension_numbers=(((1,), (1,)), ((), ())),
        preferred_element_type=jnp.float32)                          # (1, TB)
    return q + b3_scalar


def _qnet_kernel(s_ref, a_ref, w1s_ref, w1a_ref, b1_ref, w2_ref, b2_ref,
                 w3_ref, b3_ref, o_ref):
    s = s_ref[...].astype(jnp.bfloat16)      # no-op if inputs already bf16
    a = a_ref[...].astype(jnp.bfloat16)
    q = _critic(s, a, w1s_ref[...], w1a_ref[...], b1_ref[...],
                w2_ref[...], b2_ref[...], w3_ref[...], b3_ref[0, 0])
    o_ref[...] = q.astype(o_ref.dtype)


def _twin_qnet_kernel(s_ref, a_ref,
                      w1s1_ref, w1a1_ref, b11_ref, w21_ref, b21_ref,
                      w31_ref, b31_ref,
                      w1s2_ref, w1a2_ref, b12_ref, w22_ref, b22_ref,
                      w32_ref, b32_ref,
                      o1_ref, o2_ref):
    s = s_ref[...].astype(jnp.bfloat16)
    a = a_ref[...].astype(jnp.bfloat16)
    o1_ref[...] = _critic(s, a, w1s1_ref[...], w1a1_ref[...], b11_ref[...],
                          w21_ref[...], b21_ref[...], w31_ref[...],
                          b31_ref[0, 0]).astype(o1_ref.dtype)
    o2_ref[...] = _critic(s, a, w1s2_ref[...], w1a2_ref[...], b12_ref[...],
                          w22_ref[...], b22_ref[...], w32_ref[...],
                          b32_ref[0, 0]).astype(o2_ref.dtype)


# ----------------------------------------------------------------------------
# Wrappers
# ----------------------------------------------------------------------------

_VMEM_LIMIT_BYTES = 32 * 1024 * 1024   # lifts v5e's 16 MiB default; safe on v7x


def _round_up(x, m):
    return (x + m - 1) // m * m


def _pick_block_b(B):
    # The kernel is grid-step-overhead / weight-push bound at H=256, so use
    # the biggest sensible tile:
    #   * B <= 1024: one grid step (min 128 rows for (8,128)/lane alignment).
    #   * larger B: >= 2 steps so both v7x TensorCores get batch work under
    #     dimension_semantics=("parallel",); 2048-row cap keeps the f32
    #     h1/h2 intermediates (~2 MB each) easy on v5e's scoped VMEM.
    if B <= 1024:
        return max(_round_up(B, 128), 128)
    return min(_round_up(pl.cdiv(B, 2), 256), 2048)


def _io_specs(block_b, S, A, B):
    in_io = [
        pl.BlockSpec((block_b, S), lambda i: (i, 0)),   # state tile
        pl.BlockSpec((block_b, A), lambda i: (i, 0)),   # action tile
    ]
    out_spec = pl.BlockSpec((1, block_b), lambda i: (0, i))
    return in_io, out_spec


def _critic_param_specs(S, A, H):
    # Weights/biases: same block every grid step -> VMEM-resident, no re-DMA.
    resident = lambda shape: pl.BlockSpec(shape, lambda i: (0, 0))
    smem_scalar = pl.BlockSpec(memory_space=pltpu.MemorySpace.SMEM)
    return [
        resident((S, H)),   # w1_s
        resident((A, H)),   # w1_a
        resident((1, H)),   # b1
        resident((H, H)),   # w2
        resident((1, H)),   # b2
        resident((1, H)),   # w3 (row)
        smem_scalar,        # b3 (1,1) scalar in SMEM
    ]


def qnetwork_forward(state, action, params, *, block_b=None):
    """Pallas-backed QNetwork forward.

    state: (B, S), action: (B, A)  (f32 or bf16)  ->  (B, 1) f32.
    params: (w1_s bf16 (S,H), w1_a bf16 (A,H), b1 f32 (1,H),
             w2 bf16 (H,H),  b2 f32 (1,H),
             w3 bf16 (1,H),  b3 f32 (1,1))
    """
    w1_s, w1_a, b1, w2, b2, w3, b3 = params
    B, S = state.shape
    A = action.shape[1]
    H = w2.shape[0]

    if block_b is None:
        block_b = _pick_block_b(B)
    grid = (pl.cdiv(B, block_b),)

    in_io, out_spec = _io_specs(block_b, S, A, B)

    q_row = pl.pallas_call(
        _qnet_kernel,
        out_shape=jax.ShapeDtypeStruct((1, B), jnp.float32),
        grid=grid,
        in_specs=in_io + _critic_param_specs(S, A, H),
        out_specs=out_spec,
        compiler_params=pltpu.CompilerParams(
            dimension_semantics=("parallel",),
            vmem_limit_bytes=_VMEM_LIMIT_BYTES),
    )(state, action, w1_s, w1_a, b1, w2, b2, w3, b3)

    return q_row.reshape(B, 1)


def twin_qnetwork_forward(state, action, params1, params2, *, block_b=None):
    """SAC twin critic: both Q1 and Q2 in a single fused pallas_call.

    Returns (q1, q2), each (B, 1) f32.
    """
    B, S = state.shape
    A = action.shape[1]
    H = params1[3].shape[0]

    if block_b is None:
        block_b = _pick_block_b(B)
    grid = (pl.cdiv(B, block_b),)

    in_io, out_spec = _io_specs(block_b, S, A, B)
    param_specs = _critic_param_specs(S, A, H)

    q1_row, q2_row = pl.pallas_call(
        _twin_qnet_kernel,
        out_shape=(jax.ShapeDtypeStruct((1, B), jnp.float32),
                   jax.ShapeDtypeStruct((1, B), jnp.float32)),
        grid=grid,
        in_specs=in_io + param_specs + param_specs,
        out_specs=(out_spec, out_spec),
        compiler_params=pltpu.CompilerParams(
            dimension_semantics=("parallel",),
            vmem_limit_bytes=_VMEM_LIMIT_BYTES),
    )(state, action, *params1, *params2)

    return q1_row.reshape(B, 1), q2_row.reshape(B, 1)


# ----------------------------------------------------------------------------
# Params / reference
# ----------------------------------------------------------------------------

def init_qnetwork_params(key, state_dim, action_dim, hidden_dim=256):
    """Init mimicking nn.Linear's U(-1/sqrt(fan_in), 1/sqrt(fan_in)),
    converted to kernel layout (split w1, bf16 weights, f32 biases)."""
    d_in = state_dim + action_dim
    ks = jax.random.split(key, 6)

    def lin(kw, kb, fan_in, fan_out):
        bound = 1.0 / jnp.sqrt(jnp.float32(fan_in))
        w = jax.random.uniform(kw, (fan_in, fan_out), jnp.float32, -bound, bound)
        b = jax.random.uniform(kb, (1, fan_out), jnp.float32, -bound, bound)
        return w, b

    w1, b1 = lin(ks[0], ks[1], d_in, hidden_dim)
    w2, b2 = lin(ks[2], ks[3], hidden_dim, hidden_dim)
    w3, b3 = lin(ks[4], ks[5], hidden_dim, 1)

    w1_s = w1[:state_dim].astype(jnp.bfloat16)      # (S, H)
    w1_a = w1[state_dim:].astype(jnp.bfloat16)      # (A, H)
    w2_b = w2.astype(jnp.bfloat16)                  # (H, H)
    w3_r = w3.T.astype(jnp.bfloat16)                # (1, H)
    return (w1_s, w1_a, b1, w2_b, b2, w3_r, b3)     # b3: (1, 1) f32


def qnetwork_reference(state, action, params):
    """Pure-JAX reference with the same (bf16 weights, f32 accumulate) numerics."""
    w1_s, w1_a, b1, w2, b2, w3, b3 = params
    s = state.astype(jnp.bfloat16)
    a = action.astype(jnp.bfloat16)
    h1 = (jnp.dot(s, w1_s, preferred_element_type=jnp.float32)
          + jnp.dot(a, w1_a, preferred_element_type=jnp.float32) + b1)
    h1 = jnp.maximum(h1, 0.0)
    h2 = jnp.dot(h1.astype(jnp.bfloat16), w2,
                 preferred_element_type=jnp.float32) + b2
    h2 = jnp.maximum(h2, 0.0)
    q = jnp.dot(h2.astype(jnp.bfloat16), w3.T,
                preferred_element_type=jnp.float32) + b3
    return q


# ----------------------------------------------------------------------------
# Self-test
# ----------------------------------------------------------------------------

if __name__ == "__main__":
    key = jax.random.PRNGKey(0)
    k_p1, k_p2, k_s, k_a, k_s2, k_a2 = jax.random.split(key, 6)

    batch = 8
    state_dim = 24
    action_dim = 8
    hidden_dim = 256  # module default

    params1 = init_qnetwork_params(k_p1, state_dim, action_dim, hidden_dim)
    params2 = init_qnetwork_params(k_p2, state_dim, action_dim, hidden_dim)

    state = jax.random.normal(k_s, (batch, state_dim), jnp.float32)
    action = jax.random.normal(k_a, (batch, action_dim), jnp.float32)

    # Single critic (one grid step).
    q = jax.block_until_ready(qnetwork_forward(state, action, params1))
    q_ref = qnetwork_reference(state, action, params1)
    assert q.shape == (batch, 1), q.shape
    assert jnp.allclose(q, q_ref, atol=5e-3, rtol=5e-3), (q, q_ref)

    # Fused SAC twin critic (Q1 + Q2 in one pallas_call).
    q1, q2 = jax.block_until_ready(
        twin_qnetwork_forward(state, action, params1, params2))
    assert jnp.allclose(q1, qnetwork_reference(state, action, params1),
                        atol=5e-3, rtol=5e-3)
    assert jnp.allclose(q2, qnetwork_reference(state, action, params2),
                        atol=5e-3, rtol=5e-3)

    # Multi-tile path: grid > 1 with a masked edge tile (forced small block).
    b_big = 300
    state_b = jax.random.normal(k_s2, (b_big, state_dim), jnp.float32)
    action_b = jax.random.normal(k_a2, (b_big, action_dim), jnp.float32)
    q_b = jax.block_until_ready(
        qnetwork_forward(state_b, action_b, params1, block_b=128))
    q_b_ref = qnetwork_reference(state_b, action_b, params1)
    assert q_b.shape == (b_big, 1)
    assert jnp.allclose(q_b, q_b_ref, atol=5e-3, rtol=5e-3)

    print("KERNEL_OK")
</pallas_src>

<mosaic_0001>
module attributes {stable_mosaic.version = 11 : i64} {
  func.func @_qnet_kernel(%arg0: i32, %arg1: memref<128x24xf32, #tpu.memory_space<vmem>>, %arg2: memref<128x8xf32, #tpu.memory_space<vmem>>, %arg3: memref<24x256xbf16, #tpu.memory_space<vmem>>, %arg4: memref<8x256xbf16, #tpu.memory_space<vmem>>, %arg5: memref<1x256xf32, #tpu.memory_space<vmem>>, %arg6: memref<256x256xbf16, #tpu.memory_space<vmem>>, %arg7: memref<1x256xf32, #tpu.memory_space<vmem>>, %arg8: memref<1x256xbf16, #tpu.memory_space<vmem>>, %arg9: memref<1x1xf32, #tpu.memory_space<smem>>, %arg10: memref<1x128xf32, #tpu.memory_space<vmem>>) attributes {dimension_semantics = [#tpu.dimension_semantics<parallel>], iteration_bounds = array<i64: 1>, scalar_prefetch = 0 : i64, scratch_operands = 0 : i64, tpu.core_type = #tpu.core_type<tc>, window_params = [{transform_indices = @transform_0, window_bounds = array<i64: 128, 24>}, {transform_indices = @transform_1, window_bounds = array<i64: 128, 8>}, {pipeline_mode = #tpu.pipeline_mode<synchronous>, transform_indices = @transform_2, window_bounds = array<i64: 24, 256>}, {pipeline_mode = #tpu.pipeline_mode<synchronous>, transform_indices = @transform_3, window_bounds = array<i64: 8, 256>}, {pipeline_mode = #tpu.pipeline_mode<synchronous>, transform_indices = @transform_4, window_bounds = array<i64: 1, 256>}, {pipeline_mode = #tpu.pipeline_mode<synchronous>, transform_indices = @transform_5, window_bounds = array<i64: 256, 256>}, {pipeline_mode = #tpu.pipeline_mode<synchronous>, transform_indices = @transform_6, window_bounds = array<i64: 1, 256>}, {pipeline_mode = #tpu.pipeline_mode<synchronous>, transform_indices = @transform_7, window_bounds = array<i64: 1, 256>}, {transform_indices = @transform_8, window_bounds = array<i64: 1, 1>}, {transform_indices = @transform_9, window_bounds = array<i64: 1, 128>}]} {
    %c0 = arith.constant 0 : index
    %c0_0 = arith.constant 0 : index
    %0 = vector.load %arg1[%c0, %c0_0] : memref<128x24xf32, #tpu.memory_space<vmem>>, vector<128x24xf32>
    %1 = arith.truncf %0 : vector<128x24xf32> to vector<128x24xbf16>
    %c0_1 = arith.constant 0 : index
    %c0_2 = arith.constant 0 : index
    %2 = vector.load %arg2[%c0_1, %c0_2] : memref<128x8xf32, #tpu.memory_space<vmem>>, vector<128x8xf32>
    %3 = arith.truncf %2 : vector<128x8xf32> to vector<128x8xbf16>
    %c0_3 = arith.constant 0 : index
    %c0_4 = arith.constant 0 : index
    %4 = vector.load %arg3[%c0_3, %c0_4] : memref<24x256xbf16, #tpu.memory_space<vmem>>, vector<24x256xbf16>
    %c0_5 = arith.constant 0 : index
    %c0_6 = arith.constant 0 : index
    %5 = vector.load %arg4[%c0_5, %c0_6] : memref<8x256xbf16, #tpu.memory_space<vmem>>, vector<8x256xbf16>
    %c0_7 = arith.constant 0 : index
    %c0_8 = arith.constant 0 : index
    %6 = vector.load %arg5[%c0_7, %c0_8] : memref<1x256xf32, #tpu.memory_space<vmem>>, vector<1x256xf32>
    %c0_9 = arith.constant 0 : index
    %c0_10 = arith.constant 0 : index
    %7 = vector.load %arg6[%c0_9, %c0_10] : memref<256x256xbf16, #tpu.memory_space<vmem>>, vector<256x256xbf16>
    %c0_11 = arith.constant 0 : index
    %c0_12 = arith.constant 0 : index
    %8 = vector.load %arg7[%c0_11, %c0_12] : memref<1x256xf32, #tpu.memory_space<vmem>>, vector<1x256xf32>
    %c0_13 = arith.constant 0 : index
    %c0_14 = arith.constant 0 : index
    %9 = vector.load %arg8[%c0_13, %c0_14] : memref<1x256xbf16, #tpu.memory_space<vmem>>, vector<1x256xbf16>
    %c0_15 = arith.constant 0 : index
    %c0_16 = arith.constant 0 : index
    %10 = memref.load %arg9[%c0_15, %c0_16] : memref<1x1xf32, #tpu.memory_space<smem>>
    %cst = arith.constant dense<0.000000e+00> : vector<128x256xf32>
    %11 = tpu.matmul %1, %4, %cst {dimension_numbers = #tpu.dot_dimension_numbers<[1], [0], [0], [1], [0, 0, 1, 1], [], []>} : vector<128x24xbf16>, vector<24x256xbf16>, vector<128x256xf32> -> vector<128x256xf32>
    %cst_17 = arith.constant dense<0.000000e+00> : vector<128x256xf32>
    %12 = tpu.matmul %3, %5, %cst_17 {dimension_numbers = #tpu.dot_dimension_numbers<[1], [0], [0], [1], [0, 0, 1, 1], [], []>} : vector<128x8xbf16>, vector<8x256xbf16>, vector<128x256xf32> -> vector<128x256xf32>
    %13 = arith.addf %11, %12 : vector<128x256xf32>
    %14 = vector.broadcast %6 : vector<1x256xf32> to vector<128x256xf32>
    %15 = arith.addf %13, %14 : vector<128x256xf32>
    %cst_18 = arith.constant 0.000000e+00 : f32
    %16 = vector.broadcast %cst_18 : f32 to vector<128x256xf32>
    %17 = arith.maximumf %15, %16 : vector<128x256xf32>
    %18 = arith.truncf %17 : vector<128x256xf32> to vector<128x256xbf16>
    %cst_19 = arith.constant dense<0.000000e+00> : vector<128x256xf32>
    %19 = tpu.matmul %18, %7, %cst_19 {dimension_numbers = #tpu.dot_dimension_numbers<[1], [0], [0], [1], [0, 0, 1, 1], [], []>} : vector<128x256xbf16>, vector<256x256xbf16>, vector<128x256xf32> -> vector<128x256xf32>
    %20 = vector.broadcast %8 : vector<1x256xf32> to vector<128x256xf32>
    %21 = arith.addf %19, %20 : vector<128x256xf32>
    %cst_20 = arith.constant 0.000000e+00 : f32
    %22 = vector.broadcast %cst_20 : f32 to vector<128x256xf32>
    %23 = arith.maximumf %21, %22 : vector<128x256xf32>
    %24 = arith.truncf %23 : vector<128x256xf32> to vector<128x256xbf16>
    %cst_21 = arith.constant dense<0.000000e+00> : vector<1x128xf32>
    %25 = tpu.matmul %9, %24, %cst_21 {dimension_numbers = #tpu.dot_dimension_numbers<[1], [1], [0], [0], [0, 0, 1, 0], [], []>} : vector<1x256xbf16>, vector<128x256xbf16>, vector<1x128xf32> -> vector<1x128xf32>
    %26 = vector.broadcast %10 : f32 to vector<1x128xf32>
    %27 = arith.addf %25, %26 : vector<1x128xf32>
    %c0_22 = arith.constant 0 : index
    %c0_23 = arith.constant 0 : index
    %28 = vector.load %arg10[%c0_22, %c0_23] : memref<1x128xf32, #tpu.memory_space<vmem>>, vector<1x128xf32>
    tpu.vector_store %arg10[%c0_22, %c0_23], %27 {strides = array<i32>} : memref<1x128xf32, #tpu.memory_space<vmem>>, vector<1x128xf32>,
    return
  }
  func.func @transform_0(%arg0: i32) -> (i32, i32) {
    %c0_i32 = arith.constant 0 : i32
    %c0_i32_0 = arith.constant 0 : i32
    return %arg0, %c0_i32 : i32, i32
  }
  func.func @transform_1(%arg0: i32) -> (i32, i32) {
    %c0_i32 = arith.constant 0 : i32
    %c0_i32_0 = arith.constant 0 : i32
    return %arg0, %c0_i32 : i32, i32
  }
  func.func @transform_2(%arg0: i32) -> (i32, i32) {
    %c0_i32 = arith.constant 0 : i32
    %c0_i32_0 = arith.constant 0 : i32
    %c0_i32_1 = arith.constant 0 : i32
    return %c0_i32, %c0_i32_0 : i32, i32
  }
  func.func @transform_3(%arg0: i32) -> (i32, i32) {
    %c0_i32 = arith.constant 0 : i32
    %c0_i32_0 = arith.constant 0 : i32
    %c0_i32_1 = arith.constant 0 : i32
    return %c0_i32, %c0_i32_0 : i32, i32
  }
  func.func @transform_4(%arg0: i32) -> (i32, i32) {
    %c0_i32 = arith.constant 0 : i32
    %c0_i32_0 = arith.constant 0 : i32
    %c0_i32_1 = arith.constant 0 : i32
    return %c0_i32, %c0_i32_0 : i32, i32
  }
  func.func @transform_5(%arg0: i32) -> (i32, i32) {
    %c0_i32 = arith.constant 0 : i32
    %c0_i32_0 = arith.constant 0 : i32
    %c0_i32_1 = arith.constant 0 : i32
    return %c0_i32, %c0_i32_0 : i32, i32
  }
  func.func @transform_6(%arg0: i32) -> (i32, i32) {
    %c0_i32 = arith.constant 0 : i32
    %c0_i32_0 = arith.constant 0 : i32
    %c0_i32_1 = arith.constant 0 : i32
    return %c0_i32, %c0_i32_0 : i32, i32
  }
  func.func @transform_7(%arg0: i32) -> (i32, i32) {
    %c0_i32 = arith.constant 0 : i32
    %c0_i32_0 = arith.constant 0 : i32
    %c0_i32_1 = arith.constant 0 : i32
    return %c0_i32, %c0_i32_0 : i32, i32
  }
  func.func @transform_8(%arg0: i32) -> (i32, i32) {
    %c0_i32 = arith.constant 0 : i32
    %c0_i32_0 = arith.constant 0 : i32
    %c0_i32_1 = arith.constant 0 : i32
    return %c0_i32, %c0_i32_0 : i32, i32
  }
  func.func @transform_9(%arg0: i32) -> (i32, i32) {
    %c0_i32 = arith.constant 0 : i32
    %c0_i32_0 = arith.constant 0 : i32
    return %c0_i32, %arg0 : i32, i32
  }
}

</mosaic_0001>

<bundles_post_ra>
// kernel: tpu_custom_call.1
= control target key start
LH: loop header
LB: loop body
LE: loop exit
PB: predicated region body
PF: predicated region fallthrough
CT: control target
= control target key end

     0   :  { %15 = vsyncpa [#allocation4], 0  ;;  %s1621_s0 = inlined_call_operand.hbm [shape: f32[8,24], index: 0, kind: input, shape index: {}]   ;;  %s1622_s1 = inlined_call_operand.hbm [shape: f32[8,8], index: 1, kind: input, shape index: {}]   ;;  %s1623_s2 = inlined_call_operand.hbm [shape: bf16[24,256], index: 2, kind: input, shape index: {}]   ;;  %s1624_s3 = inlined_call_operand.hbm [shape: bf16[8,256], index: 3, kind: input, shape index: {}]   ;;  %s1625_s4 = inlined_call_operand.vmem [shape: f32[1,256], index: 4, kind: input, shape index: {}]   ;;  %s1626_s5 = inlined_call_operand.hbm [shape: bf16[256,256], index: 5, kind: input, shape index: {}]   ;;  %s1627_s6 = inlined_call_operand.vmem [shape: f32[1,256], index: 6, kind: input, shape index: {}]   ;;  %s1628_s7 = inlined_call_operand.vmem [shape: bf16[1,256], index: 7, kind: input, shape index: {}]   ;;  %s1629_s8 = inlined_call_operand.<no memory space> [shape: f32[1,1], index: 8, kind: input, shape index: {}]   ;;  %s1630_s9 = inlined_call_operand.hbm [shape: f32[1,8], index: 9, kind: output, shape index: {}]  }
   0x1   :  { %16 = vsyncpa [#allocation7], 0 }
   0x2   :  { %17 = vsyncpa [#allocation10], 0 }
   0x3   :  { %18 = vsyncpa [#allocation5], 0 }
   0x4   :  { %22 = vsyncadd [#allocation4], 1920  ;;  %s23_s11 = sshll.u32 %s1621_s0, 4  ;;  %s1387_s12 = smov [#allocation3]   ;;  %s24_s11 = int_to_ptr.hbm [resolvable:$true] %s23_s11 }
   0x5   :  { %s25_s13 = sshll.u32 %s1387_s12, 4  ;;  %s1388_s14 = smov 128   ;;  %s26_s13 = int_to_ptr.vmem [resolvable:$true] %s25_s13 }
   0x6   :  { %s1389_s15 = smov 8  }
   0x7   :  { %31 = dma.hbm_to_vmem [thread:$0]  %s24_s11, 128, %s26_s13, [#allocation4], %s1388_s14, %s1388_s14, %s1389_s15  }
   0x8   :  { %35 = vsyncadd [#allocation7], 1920  ;;  %s36_s18 = sshll.u32 %s1622_s1, 4  ;;  %s1390_s19 = smov [#allocation6]   ;;  %s37_s18 = int_to_ptr.hbm [resolvable:$true] %s36_s18 }
   0x9   :  { %s38_s20 = sshll.u32 %s1390_s19, 4  ;;  %s63_s22 = sshll.u32 %s1624_s3, 4  ;;  %s39_s20 = int_to_ptr.vmem [resolvable:$true] %s38_s20  ;;  %s64_s22 = int_to_ptr.hbm [resolvable:$true] %s63_s22 }
   0xa   :  { %44 = dma.hbm_to_vmem [thread:$0]  %s37_s18, 128, %s39_s20, [#allocation7], %s1388_s14, %s1388_s14, %s1389_s15  }
   0xb   :  { %s1391_s23 = smov [#allocation9]   ;;  %s49_s27 = sshll.u32 %s1623_s2, 4  ;;  %s50_s27 = int_to_ptr.hbm [resolvable:$true] %s49_s27 }
   0xc   :  { %s65_s24 = sshll.u32 %s1391_s23, 4  ;;  %s75_s29 = sshll.u32 %s1626_s5, 4  ;;  %s66_s24 = int_to_ptr.vmem [resolvable:$true] %s65_s24  ;;  %s76_s29 = int_to_ptr.hbm [resolvable:$true] %s75_s29 }
   0xd   :  { %68 = dma.hbm_to_vmem [thread:$0]  %s64_s22, 128, %s66_s24, [#allocation10]  }
   0xe   :  { %s1392_s30 = smov [#allocation8]   ;;  %s1393_s10 = smov [#allocation11]  }
   0xf   :  { %s51_s3 = sshll.u32 %s1392_s30, 4  ;;  %s77_s11 = sshll.u32 %s1393_s10, 4  ;;  %s52_s3 = int_to_ptr.vmem [resolvable:$true] %s51_s3  ;;  %s78_s11 = int_to_ptr.vmem [resolvable:$true] %s77_s11 }
  0x10   :  { %57 = dma.hbm_to_vmem [thread:$0]  %s50_s27, 384, %s52_s3, [#allocation7], %s1388_s14, %s1388_s14, %s1389_s15  }
  0x11   :  { %83 = dma.hbm_to_vmem [thread:$0]  %s76_s29, 4096, %s78_s11, [#allocation10], %s1388_s14, %s1388_s14, %s1389_s15  }
  0x12   :  { %1379 = dma.done.wait [#allocation4], 2048  }
  0x13   :  { %1380 = vsyncadd [#allocation4], 4294965248 }
  0x14   :  { %1381 = dma.done.wait [#allocation7], 2432  }
  0x15   :  { %1382 = vsyncadd [#allocation7], 4294964864 }
  0x16   :  { %1383 = dma.done.wait [#allocation10], 4224  }
  0x17   :  { %1384 = vsyncadd [#allocation10], 4294963072  ;;  %v161_v0 = vld [vmem:[#allocation8 + $0x10] sm:$0xff]  ;;  %v162_v1 = vld [vmem:[#allocation9] sm:$0xff]  ;;  %vm229_vm0 = vcmask 1043456   ;;  %vm204_vm1 = vcmask 64512  }
  0x18   :  { %v341_v2 = vunpack.c.l.b16 %v161_v0  ;;  %v342_v3 = vunpack.c.h.b16 %v161_v0  ;;  %v200_v4 = vunpack.c.l.b16 %v162_v1  ;;  %v201_v5 = vunpack.c.h.b16 %v162_v1  ;;  %v1043_v6 = vld [vmem:[#allocation8] sm:$0xf]  ;;  %v1194_v11 = vld [vmem:[#allocation8 + $0x4] sm:$0xf0]  ;;  %v1193_v12 = vld [vmem:[#allocation8 + $0x4] sm:$0xf] }
  0x19   :  { %v1045_v13 = vld [vmem:[#allocation8 + $0x8] sm:$0xf0]  ;;  %v135_v14 = vld [vmem:[#allocation6] sm:$0xff]  ;;  %v1044_v20 = vor.u32 %v1194_v11, %v1043_v6  ;;  %vm349_vm2 = vcmask 195584   ;;  %v137_v26 = vld [vmem:[#allocation6 + $0x10] sm:$0xff]  ;;  %s1394_s15 = smov [#allocation12]  }
  0x1a   :  { %v345_v7 = vpack.c.b16 %v341_v2, %v341_v2  ;;  %v346_v8 = vpack.c.b16 %v342_v3, %v342_v3  ;;  %v202_v9 = vpack.c.b16 %v200_v4, %v200_v4  ;;  %v203_v10 = vpack.c.b16 %v201_v5, %v201_v5  ;;  %v136_v15 = vld [vmem:[#allocation6 + $0x8] sm:$0xff]  ;;  %v111_v22 = vld [vmem:[#allocation3] sm:$0xff]  ;;  %v138_v27 = vld [vmem:[#allocation6 + $0x18] sm:$0xff]  ;;  %s1011_s16 = sshll.u32 %s1394_s15, 4  ;;  %s1013_s19 = sshll.u32 %s1630_s9, 4  ;;  %s1012_s16 = int_to_ptr.vmem [resolvable:$true] %s1011_s16  ;;  %s1014_s19 = int_to_ptr.hbm [resolvable:$true] %s1013_s19 }
  0x1b   :  { %v1048_v21 = vor.u32 %v1193_v12, %v1045_v13  ;;  %v112_v23 = vld [vmem:[#allocation3 + $0x8] sm:$0xff]  ;;  %v151_v24 = vpack.c.bf16 %v136_v15, %v135_v14  ;;  %v113_v28 = vld [vmem:[#allocation3 + $0x10] sm:$0xff]  ;;  %v114_v29 = vld [vmem:[#allocation3 + $0x18] sm:$0xff]  ;;  %v152_v30 = vpack.c.bf16 %v138_v27, %v137_v26 }
  0x1c   :  { %v375_v16 = vsel %vm229_vm0, %v345_v7, 0  ;;  %v378_v17 = vsel %vm229_vm0, %v346_v8, 0  ;;  %v231_v18 = vsel %vm229_vm0, %v202_v9, 0  ;;  %v234_v19 = vsel %vm229_vm0, %v203_v10, 0  ;;  %v139_v32 = vld [vmem:[#allocation6 + $0x20] sm:$0xff]  ;;  %v140_v33 = vld [vmem:[#allocation6 + $0x28] sm:$0xff] }
  0x1d   :  { %386 = vmatpush.bf16.msra.mxu2 %v375_v16  ;;  %435 = vmatpush.bf16.msra.mxu3 %v378_v17  ;;  %v127_v25 = vpack.c.bf16 %v112_v23, %v111_v22  ;;  %v128_v31 = vpack.c.bf16 %v114_v29, %v113_v28  ;;  %v115_v34 = vld [vmem:[#allocation3 + $0x20] sm:$0xff]  ;;  %v116_v35 = vld [vmem:[#allocation3 + $0x28] sm:$0xff]  ;;  %v153_v36 = vpack.c.bf16 %v140_v33, %v139_v32  ;;  %v141_v38 = vld [vmem:[#allocation6 + $0x30] sm:$0xff] }
  0x1e   :  { %243 = vmatpush.bf16.msra.mxu0 %v231_v18  ;;  %292 = vmatpush.bf16.msra.mxu1 %v234_v19  ;;  %v129_v37 = vpack.c.bf16 %v116_v35, %v115_v34  ;;  %v142_v39 = vld [vmem:[#allocation6 + $0x38] sm:$0xff]  ;;  %v117_v40 = vld [vmem:[#allocation3 + $0x30] sm:$0xff]  ;;  %v143_v56 = vld [vmem:[#allocation6 + $0x40] sm:$0xff] }
  0x1f   :  { %v118_v41 = vld [vmem:[#allocation3 + $0x38] sm:$0xff]  ;;  %v154_v42 = vpack.c.bf16 %v142_v39, %v141_v38  ;;  %v1209_v44 = vld [vmem:[#allocation11 + $0x74] sm:$0xf]  ;;  %v1123_v49 = vld [vmem:[#allocation11 + $0x70] sm:$0xf] }
  0x20   :  { %v130_v43 = vpack.c.bf16 %v118_v41, %v117_v40  ;;  %v1125_v45 = vld [vmem:[#allocation11 + $0x78] sm:$0xf0]  ;;  %v1225_v46 = vld [vmem:[#allocation11 + $0xf4] sm:$0xf]  ;;  %v1210_v50 = vld [vmem:[#allocation11 + $0x74] sm:$0xf0] }
  0x21   :  { %387 = vmatpush.bf16.msra.mxu2 %v1044_v20  ;;  %436 = vmatpush.bf16.msra.mxu3 %v1048_v21  ;;  %v1128_v47 = vor.u32 %v1209_v44, %v1125_v45  ;;  %v1189_v48 = vld [vmem:[#allocation11 + $0xf8] sm:$0xf0]  ;;  %v1124_v52 = vor.u32 %v1210_v50, %v1123_v49  ;;  %v1187_v53 = vld [vmem:[#allocation11 + $0xf0] sm:$0xf]  ;;  %v1226_v54 = vld [vmem:[#allocation11 + $0xf4] sm:$0xf0] }
  0x22   :  { %1025 = vmatmul.msk.bf16.vlgmr.msra.gmra.mxu0 %vm204_vm1, %v151_v24  ;;  %1033 = vmatmul.msk.bf16.vlgmr.msra.gmra.mxu1 %vm204_vm1, %v151_v24  ;;  %v1192_v51 = vor.u32 %v1225_v46, %v1189_v48  ;;  %v1188_v55 = vor.u32 %v1226_v54, %v1187_v53  ;;  %v144_v57 = vld [vmem:[#allocation6 + $0x48] sm:$0xff]  ;;  %v119_v58 = vld [vmem:[#allocation3 + $0x40] sm:$0xff]  ;;  %v145_v10 = vld [vmem:[#allocation6 + $0x50] sm:$0xff] }
  0x23   :  { %728 = vmatpush.bf16.msrb.mxu0 %v1124_v52  ;;  %v120_v59 = vld [vmem:[#allocation3 + $0x48] sm:$0xff]  ;;  %v155_v60 = vpack.c.bf16 %v144_v57, %v143_v56  ;;  %v1207_v62 = vld [vmem:[#allocation11 + $0x64] sm:$0xf]  ;;  %v1115_v3 = vld [vmem:[#allocation11 + $0x60] sm:$0xf] }
  0x24   :  { %1049 = vmatmul.msk.bf16.vlgmr.msra.gmra.mxu2 %vm349_vm2, %v127_v25  ;;  %1057 = vmatmul.msk.bf16.vlgmr.msra.gmra.mxu3 %vm349_vm2, %v127_v25  ;;  %v131_v61 = vpack.c.bf16 %v120_v59, %v119_v58  ;;  %v1117_v63 = vld [vmem:[#allocation11 + $0x68] sm:$0xf0]  ;;  %v1223_v0 = vld [vmem:[#allocation11 + $0xe4] sm:$0xf]  ;;  %v1208_v4 = vld [vmem:[#allocation11 + $0x64] sm:$0xf0] }
  0x25   :  { %826 = vmatpush.bf16.msrb.mxu2 %v1128_v47  ;;  %875 = vmatpush.bf16.msrb.mxu3 %v1192_v51  ;;  %v1120_v1 = vor.u32 %v1207_v62, %v1117_v63  ;;  %v1181_v2 = vld [vmem:[#allocation11 + $0xe8] sm:$0xf0]  ;;  %v1116_v6 = vor.u32 %v1208_v4, %v1115_v3  ;;  %v1179_v7 = vld [vmem:[#allocation11 + $0xe0] sm:$0xf]  ;;  %v1224_v8 = vld [vmem:[#allocation11 + $0xe4] sm:$0xf0] }
  0x26   :  { %777 = vmatpush.bf16.msrb.mxu1 %v1188_v55  ;;  %v1184_v5 = vor.u32 %v1223_v0, %v1181_v2  ;;  %v1180_v9 = vor.u32 %v1224_v8, %v1179_v7  ;;  %v146_v11 = vld [vmem:[#allocation6 + $0x58] sm:$0xff]  ;;  %v121_v12 = vld [vmem:[#allocation3 + $0x50] sm:$0xff]  ;;  %v147_v22 = vld [vmem:[#allocation6 + $0x60] sm:$0xff] }
  0x27   :  { %729 = vmatpush.bf16.msrb.mxu0 %v1116_v6  ;;  %v122_v13 = vld [vmem:[#allocation3 + $0x58] sm:$0xff]  ;;  %v156_v14 = vpack.c.bf16 %v146_v11, %v145_v10  ;;  %v1205_v16 = vld [vmem:[#allocation11 + $0x54] sm:$0xf]  ;;  %v148_v23 = vld [vmem:[#allocation6 + $0x68] sm:$0xff] }
  0x28   :  { %v132_v15 = vpack.c.bf16 %v122_v13, %v121_v12  ;;  %v1109_v17 = vld [vmem:[#allocation11 + $0x58] sm:$0xf0]  ;;  %v1221_v18 = vld [vmem:[#allocation11 + $0xd4] sm:$0xf]  ;;  %v123_v24 = vld [vmem:[#allocation3 + $0x60] sm:$0xff]  ;;  %v157_v26 = vpack.c.bf16 %v148_v23, %v147_v22 }
  0x29   :  { %827 = vmatpush.bf16.msrb.mxu2 %v1120_v1  ;;  %876 = vmatpush.bf16.msrb.mxu3 %v1184_v5  ;;  %v1112_v19 = vor.u32 %v1205_v16, %v1109_v17  ;;  %v1173_v20 = vld [vmem:[#allocation11 + $0xd8] sm:$0xf0]  ;;  %v124_v25 = vld [vmem:[#allocation3 + $0x68] sm:$0xff]  ;;  %v1107_v27 = vld [vmem:[#allocation11 + $0x50] sm:$0xf] }
  0x2a   :  { %778 = vmatpush.bf16.msrb.mxu1 %v1180_v9  ;;  %v1176_v21 = vor.u32 %v1221_v18, %v1173_v20  ;;  %v1206_v28 = vld [vmem:[#allocation11 + $0x54] sm:$0xf0]  ;;  %v1171_v29 = vld [vmem:[#allocation11 + $0xd0] sm:$0xf]  ;;  %v1099_v32 = vld [vmem:[#allocation11 + $0x40] sm:$0xf]  ;;  %v133_v34 = vpack.c.bf16 %v124_v25, %v123_v24 }
  0x2b   :  { %v1204_v33 = vld [vmem:[#allocation11 + $0x44] sm:$0xf0]  ;;  %v1203_v38 = vld [vmem:[#allocation11 + $0x44] sm:$0xf]  ;;  %v1101_v40 = vld [vmem:[#allocation11 + $0x48] sm:$0xf0] }
  0x2c   :  { %v1100_v39 = vor.u32 %v1204_v33, %v1099_v32  ;;  %v1219_v41 = vld [vmem:[#allocation11 + $0xc4] sm:$0xf]  ;;  %v1091_v46 = vld [vmem:[#allocation11 + $0x30] sm:$0xf]  ;;  %v1202_v47 = vld [vmem:[#allocation11 + $0x34] sm:$0xf0] }
  0x2d   :  { %828 = vmatpush.bf16.msrb.mxu2 %v1112_v19  ;;  %877 = vmatpush.bf16.msrb.mxu3 %v1176_v21  ;;  %v1092_v48 = vor.u32 %v1202_v47, %v1091_v46  ;;  %v1155_v49 = vld [vmem:[#allocation11 + $0xb0] sm:$0xf]  ;;  %v1218_v50 = vld [vmem:[#allocation11 + $0xb4] sm:$0xf0]  ;;  %v1201_v52 = vld [vmem:[#allocation11 + $0x34] sm:$0xf] }
  0x2e   :  { %v1156_v51 = vor.u32 %v1218_v50, %v1155_v49  ;;  %v1093_v53 = vld [vmem:[#allocation11 + $0x38] sm:$0xf0]  ;;  %v1217_v54 = vld [vmem:[#allocation11 + $0xb4] sm:$0xf]  ;;  %v1083_v62 = vld [vmem:[#allocation11 + $0x20] sm:$0xf] }
  0x2f   :  { %v149_v55 = vld [vmem:[#allocation6 + $0x70] sm:$0xff]  ;;  %v150_v56 = vld [vmem:[#allocation6 + $0x78] sm:$0xff]  ;;  %v1096_v57 = vor.u32 %v1201_v52, %v1093_v53  ;;  %v1200_v63 = vld [vmem:[#allocation11 + $0x24] sm:$0xf0] }
  0x30   :  { %v1157_v58 = vld [vmem:[#allocation11 + $0xb8] sm:$0xf0]  ;;  %v125_v59 = vld [vmem:[#allocation3 + $0x70] sm:$0xff]  ;;  %v1084_v0 = vor.u32 %v1200_v63, %v1083_v62  ;;  %v1147_v1 = vld [vmem:[#allocation11 + $0xa0] sm:$0xf]  ;;  %v158_v8 = vpack.c.bf16 %v150_v56, %v149_v55 }
  0x31   :  { %v1216_v2 = vld [vmem:[#allocation11 + $0xa4] sm:$0xf0]  ;;  %v1199_v3 = vld [vmem:[#allocation11 + $0x24] sm:$0xf]  ;;  %v1085_v5 = vld [vmem:[#allocation11 + $0x28] sm:$0xf0] }
  0x32   :  { %1026 = vmatmul.msk.bf16.gmra.mxu0 %vm204_vm1, %v152_v30  ;;  %1034 = vmatmul.msk.bf16.gmra.mxu1 %vm204_vm1, %v152_v30  ;;  %v1108_v30 = vor.u32 %v1206_v28, %v1107_v27  ;;  %v1148_v4 = vor.u32 %v1216_v2, %v1147_v1  ;;  %v1215_v6 = vld [vmem:[#allocation11 + $0xa4] sm:$0xf]  ;;  %v1149_v7 = vld [vmem:[#allocation11 + $0xa8] sm:$0xf0]  ;;  %v1088_v9 = vor.u32 %v1199_v3, %v1085_v5  ;;  %v1075_v11 = vld [vmem:[#allocation11 + $0x10] sm:$0xf] }
  0x33   :  { %v1152_v10 = vor.u32 %v1215_v6, %v1149_v7  ;;  %v1198_v12 = vld [vmem:[#allocation11 + $0x14] sm:$0xf0]  ;;  %v1139_v13 = vld [vmem:[#allocation11 + $0x90] sm:$0xf]  ;;  %v1197_v17 = vld [vmem:[#allocation11 + $0x14] sm:$0xf] }
  0x34   :  { %1050 = vmatmul.msk.bf16.gmra.mxu2 %vm349_vm2, %v128_v31  ;;  %1058 = vmatmul.msk.bf16.gmra.mxu3 %vm349_vm2, %v128_v31  ;;  %v1222_v31 = vld [vmem:[#allocation11 + $0xd4] sm:$0xf0]  ;;  %v1077_v18 = vld [vmem:[#allocation11 + $0x18] sm:$0xf0]  ;;  %v1213_v21 = vld [vmem:[#allocation11 + $0x94] sm:$0xf] }
  0x35   :  { %v1172_v35 = vor.u32 %v1222_v31, %v1171_v29  ;;  %730 = vmatpush.bf16.msrb.mxu0 %v1108_v30  ;;  %v1214_v16 = vld [vmem:[#allocation11 + $0x94] sm:$0xf0]  ;;  %v1080_v20 = vor.u32 %v1197_v17, %v1077_v18  ;;  %v1141_v22 = vld [vmem:[#allocation11 + $0x98] sm:$0xf0]  ;;  %v1067_v24 = vld [vmem:[#allocation11] sm:$0xf] }
  0x36   :  { %v1140_v19 = vor.u32 %v1214_v16, %v1139_v13  ;;  %v1144_v23 = vor.u32 %v1213_v21, %v1141_v22  ;;  %v1196_v25 = vld [vmem:[#allocation11 + $0x4] sm:$0xf0]  ;;  %v1195_v29 = vld [vmem:[#allocation11 + $0x4] sm:$0xf]  ;;  %v1069_v30 = vld [vmem:[#allocation11 + $0x8] sm:$0xf0] }
  0x37   :  { %779 = vmatpush.bf16.msrb.mxu1 %v1172_v35  ;;  %v1068_v27 = vor.u32 %v1196_v25, %v1067_v24  ;;  %v1212_v28 = vld [vmem:[#allocation11 + $0x84] sm:$0xf0]  ;;  %v1072_v32 = vor.u32 %v1195_v29, %v1069_v30  ;;  %v1211_v33 = vld [vmem:[#allocation11 + $0x84] sm:$0xf] }
  0x39   :  { %731 = vmatpush.bf16.msrb.mxu0 %v1100_v39 }
  0x3d   :  { %732 = vmatpush.bf16.msrb.mxu0 %v1092_v48 }
  0x41   :  { %733 = vmatpush.bf16.msrb.mxu0 %v1084_v0 }
  0x42   :  { %1027 = vmatmul.msk.bf16.gmra.mxu0 %vm204_vm1, %v153_v36  ;;  %1035 = vmatmul.msk.bf16.gmra.mxu1 %vm204_vm1, %v153_v36  ;;  %v1163_v36 = vld [vmem:[#allocation11 + $0xc0] sm:$0xf] }
  0x44   :  { %1051 = vmatmul.msk.bf16.gmra.mxu2 %vm349_vm2, %v129_v37  ;;  %1059 = vmatmul.msk.bf16.gmra.mxu3 %vm349_vm2, %v129_v37  ;;  %v1220_v37 = vld [vmem:[#allocation11 + $0xc4] sm:$0xf0] }
  0x45   :  { %v1164_v45 = vor.u32 %v1220_v37, %v1163_v36 }
  0x47   :  { %780 = vmatpush.bf16.msrb.mxu1 %v1164_v45 }
  0x4b   :  { %781 = vmatpush.bf16.msrb.mxu1 %v1156_v51 }
  0x4f   :  { %782 = vmatpush.bf16.msrb.mxu1 %v1148_v4 }
  0x52   :  { %1028 = vmatmul.msk.bf16.gmra.mxu0 %vm204_vm1, %v154_v42  ;;  %1036 = vmatmul.msk.bf16.gmra.mxu1 %vm204_vm1, %v154_v42  ;;  %v1165_v42 = vld [vmem:[#allocation11 + $0xc8] sm:$0xf0] }
  0x53   :  { %v1168_v44 = vor.u32 %v1219_v41, %v1165_v42  ;;  %783 = vmatpush.bf16.msrb.mxu1 %v1140_v19  ;;  %v163_v42 = vld [vmem:[%s1625_s4] sm:$0x3] }
  0x54   :  { %1052 = vmatmul.msk.bf16.gmra.mxu2 %vm349_vm2, %v130_v43  ;;  %1060 = vmatmul.msk.bf16.gmra.mxu3 %vm349_vm2, %v130_v43  ;;  %v1104_v43 = vor.u32 %v1203_v38, %v1101_v40  ;;  %v1509_v46 = vperm.slane %v163_v42, 1 }
  0x55   :  { %878 = vmatpush.bf16.msrb.mxu3 %v1168_v44  ;;  %v1507_v44 = vperm.slane %v163_v42, 0 }
  0x56   :  { %829 = vmatpush.bf16.msrb.mxu2 %v1104_v43 }
  0x5a   :  { %830 = vmatpush.bf16.msrb.mxu2 %v1096_v57 }
  0x5e   :  { %831 = vmatpush.bf16.msrb.mxu2 %v1088_v9 }
  0x62   :  { %1029 = vmatmul.msk.bf16.gmra.mxu0 %vm204_vm1, %v155_v60  ;;  %1037 = vmatmul.msk.bf16.gmra.mxu1 %vm204_vm1, %v155_v60  ;;  %v126_v60 = vld [vmem:[#allocation3 + $0x78] sm:$0xff] }
  0x63   :  { %832 = vmatpush.bf16.msrb.mxu2 %v1080_v20 }
  0x64   :  { %1053 = vmatmul.msk.bf16.gmra.mxu2 %vm349_vm2, %v131_v61  ;;  %1061 = vmatmul.msk.bf16.gmra.mxu3 %vm349_vm2, %v131_v61  ;;  %v1160_v61 = vor.u32 %v1217_v54, %v1157_v58 }
  0x66   :  { %879 = vmatpush.bf16.msrb.mxu3 %v1160_v61 }
  0x67   :  { %833 = vmatpush.bf16.msrb.mxu2 %v1072_v32 }
  0x6a   :  { %880 = vmatpush.bf16.msrb.mxu3 %v1152_v10 }
  0x6e   :  { %881 = vmatpush.bf16.msrb.mxu3 %v1144_v23 }
  0x72   :  { %1030 = vmatmul.msk.bf16.gmra.mxu0 %vm204_vm1, %v156_v14  ;;  %1038 = vmatmul.msk.bf16.gmra.mxu1 %vm204_vm1, %v156_v14  ;;  %v134_v14 = vpack.c.bf16 %v126_v60, %v125_v59 }
  0x74   :  { %1054 = vmatmul.msk.bf16.gmra.mxu2 %vm349_vm2, %v132_v15  ;;  %1062 = vmatmul.msk.bf16.gmra.mxu3 %vm349_vm2, %v132_v15  ;;  %v1076_v15 = vor.u32 %v1198_v12, %v1075_v11 }
  0x76   :  { %734 = vmatpush.bf16.msrb.mxu0 %v1076_v15 }
  0x7a   :  { %735 = vmatpush.bf16.msrb.mxu0 %v1068_v27 }
  0x82   :  { %1031 = vmatmul.msk.bf16.gmra.mxu0 %vm204_vm1, %v157_v26  ;;  %1039 = vmatmul.msk.bf16.gmra.mxu1 %vm204_vm1, %v157_v26  ;;  %v1131_v26 = vld [vmem:[#allocation11 + $0x80] sm:$0xf] }
  0x83   :  { %v1132_v31 = vor.u32 %v1212_v28, %v1131_v26 }
  0x84   :  { %1055 = vmatmul.msk.bf16.gmra.mxu2 %vm349_vm2, %v133_v34  ;;  %1063 = vmatmul.msk.bf16.gmra.mxu3 %vm349_vm2, %v133_v34  ;;  %v1133_v34 = vld [vmem:[#allocation11 + $0x88] sm:$0xf0] }
  0x85   :  { %v1136_v35 = vor.u32 %v1211_v33, %v1133_v34  ;;  %784 = vmatpush.bf16.msrb.mxu1 %v1132_v31 }
  0x87   :  { %882 = vmatpush.bf16.msrb.mxu3 %v1136_v35 }
  0x92   :  { %1032 = vmatmul.msk.bf16.gmra.mxu0 %vm204_vm1, %v158_v8  ;;  %1040 = vmatmul.msk.bf16.gmra.mxu1 %vm204_vm1, %v158_v8 }
  0x94   :  { %1056 = vmatmul.msk.bf16.gmra.mxu2 %vm349_vm2, %v134_v14  ;;  %1064 = vmatmul.msk.bf16.gmra.mxu3 %vm349_vm2, %v134_v14 }
  0x9f   :  { %v245_v36 = vpop.f32.mrf.mxu0  ;;  %v294_v37 = vpop.f32.mrf.mxu1 }
  0xa7   :  { %v247_v38 = vpop.f32.mrf.mxu0  ;;  %v389_v39 = vpop.f32.mrf.mxu2 }
  0xa8   :  { %v438_v40 = vpop.f32.mrf.mxu3  ;;  %v296_v41 = vpop.f32.mrf.mxu1  ;;  %v390_v43 = vadd.f32 %v389_v39, %v245_v36 }
  0xa9   :  { %v439_v45 = vadd.f32 %v438_v40, %v294_v37 }
  0xaa   :  { %v483_v49 = vadd.f32 %v1507_v44, %v390_v43 }
  0xab   :  { %v484_v53 = vadd.f32 %v1509_v46, %v439_v45 }
  0xac   :  { %v515_v57 = vmax.f32 %v483_v49, 0.0 }
  0xad   :  { %v516_v59 = vmax.f32 %v484_v53, 0.0 }
  0xaf   :  { %v250_v47 = vpop.f32.mrf.mxu0  ;;  %v391_v48 = vpop.f32.mrf.mxu2 }
  0xb0   :  { %v392_v50 = vadd.f32 %v391_v48, %v247_v38  ;;  %v440_v51 = vpop.f32.mrf.mxu3  ;;  %v299_v52 = vpop.f32.mrf.mxu1 }
  0xb1   :  { %v441_v54 = vadd.f32 %v440_v51, %v296_v41 }
  0xb2   :  { %v485_v55 = vadd.f32 %v1507_v44, %v392_v50 }
  0xb3   :  { %v486_v56 = vadd.f32 %v1509_v46, %v441_v54 }
  0xb4   :  { %v517_v58 = vmax.f32 %v485_v55, 0.0 }
  0xb5   :  { %v518_v60 = vmax.f32 %v486_v56, 0.0 }
  0xb6   :  { %v547_v61 = vpack.c.bf16 %v517_v58, %v515_v57 }
  0xb7   :  { %v252_v62 = vpop.f32.mrf.mxu0  ;;  %v394_v63 = vpop.f32.mrf.mxu2  ;;  %v548_v0 = vpack.c.bf16 %v518_v60, %v516_v59 }
  0xb8   :  { %v443_v1 = vpop.f32.mrf.mxu3  ;;  %736 = vmatmul.bf16.vlgmr.msrb.gmra.mxu0 %v547_v61  ;;  %834 = vmatmul.bf16.vlgmr.msrb.gmra.mxu2 %v547_v61  ;;  %v301_v2 = vpop.f32.mrf.mxu1  ;;  %v395_v3 = vadd.f32 %v394_v63, %v250_v47 }
  0xb9   :  { %785 = vmatmul.bf16.vlgmr.msrb.gmra.mxu1 %v548_v0  ;;  %883 = vmatmul.bf16.vlgmr.msrb.gmra.mxu3 %v548_v0  ;;  %v444_v4 = vadd.f32 %v443_v1, %v299_v52 }
  0xba   :  { %v487_v7 = vadd.f32 %v1507_v44, %v395_v3 }
  0xbb   :  { %v488_v11 = vadd.f32 %v1509_v46, %v444_v4 }
  0xbc   :  { %v519_v15 = vmax.f32 %v487_v7, 0.0 }
  0xbd   :  { %v520_v17 = vmax.f32 %v488_v11, 0.0 }
  0xbf   :  { %v255_v5 = vpop.f32.mrf.mxu0  ;;  %v396_v6 = vpop.f32.mrf.mxu2 }
  0xc0   :  { %v397_v8 = vadd.f32 %v396_v6, %v252_v62  ;;  %v445_v9 = vpop.f32.mrf.mxu3  ;;  %v304_v10 = vpop.f32.mrf.mxu1 }
  0xc1   :  { %v446_v12 = vadd.f32 %v445_v9, %v301_v2 }
  0xc2   :  { %v489_v13 = vadd.f32 %v1507_v44, %v397_v8 }
  0xc3   :  { %v490_v14 = vadd.f32 %v1509_v46, %v446_v12 }
  0xc4   :  { %v521_v16 = vmax.f32 %v489_v13, 0.0 }
  0xc5   :  { %v522_v18 = vmax.f32 %v490_v14, 0.0 }
  0xc6   :  { %v549_v19 = vpack.c.bf16 %v521_v16, %v519_v15 }
  0xc7   :  { %v257_v20 = vpop.f32.mrf.mxu0  ;;  %v399_v21 = vpop.f32.mrf.mxu2  ;;  %v550_v22 = vpack.c.bf16 %v522_v18, %v520_v17 }
  0xc8   :  { %v448_v23 = vpop.f32.mrf.mxu3  ;;  %741 = vmatmul.bf16.gmra.mxu0 %v549_v19  ;;  %839 = vmatmul.bf16.gmra.mxu2 %v549_v19  ;;  %v306_v24 = vpop.f32.mrf.mxu1  ;;  %v400_v25 = vadd.f32 %v399_v21, %v255_v5 }
  0xc9   :  { %790 = vmatmul.bf16.gmra.mxu1 %v550_v22  ;;  %888 = vmatmul.bf16.gmra.mxu3 %v550_v22  ;;  %v449_v26 = vadd.f32 %v448_v23, %v304_v10 }
  0xca   :  { %v491_v29 = vadd.f32 %v1507_v44, %v400_v25 }
  0xcb   :  { %v492_v33 = vadd.f32 %v1509_v46, %v449_v26 }
  0xcc   :  { %v523_v37 = vmax.f32 %v491_v29, 0.0 }
  0xcd   :  { %v524_v39 = vmax.f32 %v492_v33, 0.0 }
  0xcf   :  { %v260_v27 = vpop.f32.mrf.mxu0  ;;  %v401_v28 = vpop.f32.mrf.mxu2 }
  0xd0   :  { %v402_v30 = vadd.f32 %v401_v28, %v257_v20  ;;  %v450_v31 = vpop.f32.mrf.mxu3  ;;  %v309_v32 = vpop.f32.mrf.mxu1 }
  0xd1   :  { %v451_v34 = vadd.f32 %v450_v31, %v306_v24 }
  0xd2   :  { %v493_v35 = vadd.f32 %v1507_v44, %v402_v30 }
  0xd3   :  { %v494_v36 = vadd.f32 %v1509_v46, %v451_v34 }
  0xd4   :  { %v525_v38 = vmax.f32 %v493_v35, 0.0 }
  0xd5   :  { %v526_v40 = vmax.f32 %v494_v36, 0.0 }
  0xd6   :  { %v551_v41 = vpack.c.bf16 %v525_v38, %v523_v37 }
  0xd7   :  { %v262_v42 = vpop.f32.mrf.mxu0  ;;  %v404_v43 = vpop.f32.mrf.mxu2  ;;  %v552_v45 = vpack.c.bf16 %v526_v40, %v524_v39 }
  0xd8   :  { %v453_v47 = vpop.f32.mrf.mxu3  ;;  %746 = vmatmul.bf16.gmra.mxu0 %v551_v41  ;;  %844 = vmatmul.bf16.gmra.mxu2 %v551_v41  ;;  %v311_v48 = vpop.f32.mrf.mxu1  ;;  %v405_v49 = vadd.f32 %v404_v43, %v260_v27 }
  0xd9   :  { %795 = vmatmul.bf16.gmra.mxu1 %v552_v45  ;;  %893 = vmatmul.bf16.gmra.mxu3 %v552_v45  ;;  %v454_v50 = vadd.f32 %v453_v47, %v309_v32 }
  0xda   :  { %v495_v53 = vadd.f32 %v1507_v44, %v405_v49 }
  0xdb   :  { %v496_v57 = vadd.f32 %v1509_v46, %v454_v50 }
  0xdc   :  { %v527_v61 = vmax.f32 %v495_v53, 0.0 }
  0xdd   :  { %v528_v63 = vmax.f32 %v496_v57, 0.0 }
  0xdf   :  { %v265_v51 = vpop.f32.mrf.mxu0  ;;  %v406_v52 = vpop.f32.mrf.mxu2 }
  0xe0   :  { %v407_v54 = vadd.f32 %v406_v52, %v262_v42  ;;  %v455_v55 = vpop.f32.mrf.mxu3  ;;  %v314_v56 = vpop.f32.mrf.mxu1 }
  0xe1   :  { %v456_v58 = vadd.f32 %v455_v55, %v311_v48 }
  0xe2   :  { %v497_v59 = vadd.f32 %v1507_v44, %v407_v54 }
  0xe3   :  { %v498_v60 = vadd.f32 %v1509_v46, %v456_v58 }
  0xe4   :  { %v529_v62 = vmax.f32 %v497_v59, 0.0 }
  0xe5   :  { %v530_v0 = vmax.f32 %v498_v60, 0.0 }
  0xe6   :  { %v553_v1 = vpack.c.bf16 %v529_v62, %v527_v61 }
  0xe7   :  { %v267_v2 = vpop.f32.mrf.mxu0  ;;  %v409_v3 = vpop.f32.mrf.mxu2  ;;  %v554_v4 = vpack.c.bf16 %v530_v0, %v528_v63 }
  0xe8   :  { %v458_v5 = vpop.f32.mrf.mxu3  ;;  %751 = vmatmul.bf16.gmra.mxu0 %v553_v1  ;;  %849 = vmatmul.bf16.gmra.mxu2 %v553_v1  ;;  %v316_v6 = vpop.f32.mrf.mxu1  ;;  %v410_v7 = vadd.f32 %v409_v3, %v265_v51 }
  0xe9   :  { %800 = vmatmul.bf16.gmra.mxu1 %v554_v4  ;;  %898 = vmatmul.bf16.gmra.mxu3 %v554_v4  ;;  %v459_v8 = vadd.f32 %v458_v5, %v314_v56 }
  0xea   :  { %v499_v11 = vadd.f32 %v1507_v44, %v410_v7 }
  0xeb   :  { %v500_v15 = vadd.f32 %v1509_v46, %v459_v8 }
  0xec   :  { %v531_v19 = vmax.f32 %v499_v11, 0.0 }
  0xed   :  { %v532_v21 = vmax.f32 %v500_v15, 0.0 }
  0xef   :  { %v270_v9 = vpop.f32.mrf.mxu0  ;;  %v411_v10 = vpop.f32.mrf.mxu2 }
  0xf0   :  { %v412_v12 = vadd.f32 %v411_v10, %v267_v2  ;;  %v460_v13 = vpop.f32.mrf.mxu3  ;;  %v319_v14 = vpop.f32.mrf.mxu1 }
  0xf1   :  { %v461_v16 = vadd.f32 %v460_v13, %v316_v6 }
  0xf2   :  { %v501_v17 = vadd.f32 %v1507_v44, %v412_v12 }
  0xf3   :  { %v502_v18 = vadd.f32 %v1509_v46, %v461_v16 }
  0xf4   :  { %v533_v20 = vmax.f32 %v501_v17, 0.0 }
  0xf5   :  { %v534_v22 = vmax.f32 %v502_v18, 0.0 }
  0xf6   :  { %v555_v23 = vpack.c.bf16 %v533_v20, %v531_v19 }
  0xf7   :  { %v272_v24 = vpop.f32.mrf.mxu0  ;;  %v414_v25 = vpop.f32.mrf.mxu2  ;;  %v556_v26 = vpack.c.bf16 %v534_v22, %v532_v21 }
  0xf8   :  { %v463_v27 = vpop.f32.mrf.mxu3  ;;  %756 = vmatmul.bf16.gmra.mxu0 %v555_v23  ;;  %854 = vmatmul.bf16.gmra.mxu2 %v555_v23  ;;  %v321_v28 = vpop.f32.mrf.mxu1  ;;  %v415_v29 = vadd.f32 %v414_v25, %v270_v9 }
  0xf9   :  { %805 = vmatmul.bf16.gmra.mxu1 %v556_v26  ;;  %903 = vmatmul.bf16.gmra.mxu3 %v556_v26  ;;  %v464_v30 = vadd.f32 %v463_v27, %v319_v14  ;;  %v196_v27 = vld [vmem:[%s1627_s6] sm:$0x3] }
  0xfa   :  { %v503_v32 = vadd.f32 %v1507_v44, %v415_v29 }
  0xfb   :  { %v504_v35 = vadd.f32 %v1509_v46, %v464_v30 }
  0xfc   :  { %v535_v41 = vmax.f32 %v503_v32, 0.0 }
  0xfd   :  { %v536_v43 = vmax.f32 %v504_v35, 0.0 }
  0xff   :  { %v416_v31 = vpop.f32.mrf.mxu2  ;;  %v275_v36 = vpop.f32.mrf.mxu0 }
 0x100   :  { %v417_v33 = vadd.f32 %v416_v31, %v272_v24  ;;  %v465_v34 = vpop.f32.mrf.mxu3  ;;  %v324_v39 = vpop.f32.mrf.mxu1  ;;  %v1549_v31 = vperm.slane %v196_v27, 1 }
 0x101   :  { %v466_v37 = vadd.f32 %v465_v34, %v321_v28  ;;  %v1546_v28 = vperm.slane %v196_v27, 0 }
 0x102   :  { %v505_v38 = vadd.f32 %v1507_v44, %v417_v33 }
 0x103   :  { %v506_v40 = vadd.f32 %v1509_v46, %v466_v37 }
 0x104   :  { %v537_v42 = vmax.f32 %v505_v38, 0.0 }
 0x105   :  { %v538_v45 = vmax.f32 %v506_v40, 0.0 }
 0x106   :  { %v557_v47 = vpack.c.bf16 %v537_v42, %v535_v41 }
 0x107   :  { %v419_v48 = vpop.f32.mrf.mxu2  ;;  %v558_v49 = vpack.c.bf16 %v538_v45, %v536_v43  ;;  %v277_v51 = vpop.f32.mrf.mxu0 }
 0x108   :  { %v468_v50 = vpop.f32.mrf.mxu3  ;;  %761 = vmatmul.bf16.gmra.mxu0 %v557_v47  ;;  %859 = vmatmul.bf16.gmra.mxu2 %v557_v47  ;;  %v420_v52 = vadd.f32 %v419_v48, %v275_v36  ;;  %v326_v53 = vpop.f32.mrf.mxu1 }
 0x109   :  { %810 = vmatmul.bf16.gmra.mxu1 %v558_v49  ;;  %908 = vmatmul.bf16.gmra.mxu3 %v558_v49  ;;  %v469_v54 = vadd.f32 %v468_v50, %v324_v39 }
 0x10a   :  { %v507_v56 = vadd.f32 %v1507_v44, %v420_v52 }
 0x10b   :  { %v508_v59 = vadd.f32 %v1509_v46, %v469_v54 }
 0x10c   :  { %v539_v63 = vmax.f32 %v507_v56, 0.0 }
 0x10d   :  { %v540_v1 = vmax.f32 %v508_v59, 0.0 }
 0x10f   :  { %v421_v55 = vpop.f32.mrf.mxu2  ;;  %v280_v2 = vpop.f32.mrf.mxu0 }
 0x110   :  { %v422_v57 = vadd.f32 %v421_v55, %v277_v51  ;;  %v470_v58 = vpop.f32.mrf.mxu3  ;;  %v329_v4 = vpop.f32.mrf.mxu1 }
 0x111   :  { %v471_v60 = vadd.f32 %v470_v58, %v326_v53 }
 0x112   :  { %v509_v61 = vadd.f32 %v1507_v44, %v422_v57 }
 0x113   :  { %v510_v62 = vadd.f32 %v1509_v46, %v471_v60 }
 0x114   :  { %v541_v0 = vmax.f32 %v509_v61, 0.0 }
 0x115   :  { %v542_v3 = vmax.f32 %v510_v62, 0.0 }
 0x116   :  { %v559_v5 = vpack.c.bf16 %v541_v0, %v539_v63 }
 0x117   :  { %v424_v6 = vpop.f32.mrf.mxu2  ;;  %v560_v7 = vpack.c.bf16 %v542_v3, %v540_v1  ;;  %v282_v11 = vpop.f32.mrf.mxu0 }
 0x118   :  { %v473_v8 = vpop.f32.mrf.mxu3  ;;  %766 = vmatmul.bf16.gmra.mxu0 %v559_v5  ;;  %864 = vmatmul.bf16.gmra.mxu2 %v559_v5  ;;  %v425_v9 = vadd.f32 %v424_v6, %v280_v2  ;;  %v331_v14 = vpop.f32.mrf.mxu1 }
 0x119   :  { %815 = vmatmul.bf16.gmra.mxu1 %v560_v7  ;;  %913 = vmatmul.bf16.gmra.mxu3 %v560_v7  ;;  %v474_v10 = vadd.f32 %v473_v8, %v329_v4 }
 0x11a   :  { %v511_v13 = vadd.f32 %v1507_v44, %v425_v9 }
 0x11b   :  { %v512_v17 = vadd.f32 %v1509_v46, %v474_v10 }
 0x11c   :  { %v543_v21 = vmax.f32 %v511_v13, 0.0 }
 0x11d   :  { %v544_v23 = vmax.f32 %v512_v17, 0.0 }
 0x11f   :  { %v426_v12 = vpop.f32.mrf.mxu2 }
 0x120   :  { %v427_v15 = vadd.f32 %v426_v12, %v282_v11  ;;  %v475_v16 = vpop.f32.mrf.mxu3 }
 0x121   :  { %v476_v18 = vadd.f32 %v475_v16, %v331_v14 }
 0x122   :  { %v513_v19 = vadd.f32 %v1507_v44, %v427_v15 }
 0x123   :  { %v514_v20 = vadd.f32 %v1509_v46, %v476_v18 }
 0x124   :  { %v545_v22 = vmax.f32 %v513_v19, 0.0 }
 0x125   :  { %v546_v24 = vmax.f32 %v514_v20, 0.0 }
 0x126   :  { %v561_v25 = vpack.c.bf16 %v545_v22, %v543_v21 }
 0x127   :  { %v562_v26 = vpack.c.bf16 %v546_v24, %v544_v23 }
 0x128   :  { %771 = vmatmul.bf16.gmra.mxu0 %v561_v25  ;;  %869 = vmatmul.bf16.gmra.mxu2 %v561_v25 }
 0x129   :  { %820 = vmatmul.bf16.gmra.mxu1 %v562_v26  ;;  %918 = vmatmul.bf16.gmra.mxu3 %v562_v26 }
 0x135   :  { %v737_v29 = vpop.f32.mrf.mxu0 }
 0x136   :  { %v738_v44 = vadd.f32 %v737_v29, %v1546_v28  ;;  %v786_v46 = vpop.f32.mrf.mxu1 }
 0x138   :  { %v787_v30 = vadd.f32 %v786_v46, %v738_v44 }
 0x13a   :  { %v924_v40 = vmax.f32 %v787_v30, 0.0 }
 0x13b   :  { %v835_v32 = vpop.f32.mrf.mxu2 }
 0x13c   :  { %v836_v33 = vadd.f32 %v835_v32, %v1549_v31  ;;  %v884_v34 = vpop.f32.mrf.mxu3 }
 0x13d   :  { %v739_v35 = vpop.f32.mrf.mxu0 }
 0x13e   :  { %v885_v36 = vadd.f32 %v884_v34, %v836_v33  ;;  %v740_v37 = vadd.f32 %v739_v35, %v1546_v28  ;;  %v788_v38 = vpop.f32.mrf.mxu1 }
 0x140   :  { %v789_v39 = vadd.f32 %v788_v38, %v740_v37  ;;  %v925_v52 = vmax.f32 %v885_v36, 0.0 }
 0x142   :  { %v926_v41 = vmax.f32 %v789_v39, 0.0 }
 0x143   :  { %v837_v42 = vpop.f32.mrf.mxu2 }
 0x144   :  { %v1553_v43 = vpack.c.bf16 %v926_v41, %v924_v40  ;;  %v838_v45 = vadd.f32 %v837_v42, %v1549_v31  ;;  %v886_v47 = vpop.f32.mrf.mxu3 }
 0x145   :  { %v742_v48 = vpop.f32.mrf.mxu0 }
 0x146   :  { %v887_v49 = vadd.f32 %v886_v47, %v838_v45  ;;  %v743_v50 = vadd.f32 %v742_v48, %v1546_v28  ;;  %v791_v51 = vpop.f32.mrf.mxu1 }
 0x148   :  { %v927_v53 = vmax.f32 %v887_v49, 0.0  ;;  %v792_v54 = vadd.f32 %v791_v51, %v743_v50 }
 0x14a   :  { %v1557_v55 = vpack.c.bf16 %v927_v53, %v925_v52  ;;  %v928_v0 = vmax.f32 %v792_v54, 0.0 }
 0x14b   :  { %v840_v56 = vpop.f32.mrf.mxu2 }
 0x14c   :  { %v841_v57 = vadd.f32 %v840_v56, %v1549_v31  ;;  %v889_v58 = vpop.f32.mrf.mxu3 }
 0x14d   :  { %v744_v59 = vpop.f32.mrf.mxu0 }
 0x14e   :  { %v890_v60 = vadd.f32 %v889_v58, %v841_v57  ;;  %v745_v61 = vadd.f32 %v744_v59, %v1546_v28  ;;  %v793_v62 = vpop.f32.mrf.mxu1 }
 0x150   :  { %v794_v63 = vadd.f32 %v793_v62, %v745_v61  ;;  %v929_v10 = vmax.f32 %v890_v60, 0.0 }
 0x152   :  { %v930_v1 = vmax.f32 %v794_v63, 0.0 }
 0x153   :  { %v842_v2 = vpop.f32.mrf.mxu2 }
 0x154   :  { %v1561_v3 = vpack.c.bf16 %v930_v1, %v928_v0  ;;  %v843_v4 = vadd.f32 %v842_v2, %v1549_v31  ;;  %v891_v5 = vpop.f32.mrf.mxu3 }
 0x155   :  { %v747_v6 = vpop.f32.mrf.mxu0 }
 0x156   :  { %v892_v7 = vadd.f32 %v891_v5, %v843_v4  ;;  %v748_v8 = vadd.f32 %v747_v6, %v1546_v28  ;;  %v796_v9 = vpop.f32.mrf.mxu1 }
 0x158   :  { %v931_v11 = vmax.f32 %v892_v7, 0.0  ;;  %v797_v12 = vadd.f32 %v796_v9, %v748_v8 }
 0x15a   :  { %v1565_v13 = vpack.c.bf16 %v931_v11, %v929_v10  ;;  %v932_v22 = vmax.f32 %v797_v12, 0.0 }
 0x15b   :  { %v845_v14 = vpop.f32.mrf.mxu2 }
 0x15c   :  { %v846_v15 = vadd.f32 %v845_v14, %v1549_v31  ;;  %v894_v16 = vpop.f32.mrf.mxu3 }
 0x15d   :  { %v749_v17 = vpop.f32.mrf.mxu0 }
 0x15e   :  { %v895_v18 = vadd.f32 %v894_v16, %v846_v15  ;;  %v750_v19 = vadd.f32 %v749_v17, %v1546_v28  ;;  %v798_v20 = vpop.f32.mrf.mxu1 }
 0x160   :  { %v799_v21 = vadd.f32 %v798_v20, %v750_v19  ;;  %v933_v32 = vmax.f32 %v895_v18, 0.0 }
 0x162   :  { %v934_v23 = vmax.f32 %v799_v21, 0.0 }
 0x163   :  { %v847_v24 = vpop.f32.mrf.mxu2 }
 0x164   :  { %v1569_v25 = vpack.c.bf16 %v934_v23, %v932_v22  ;;  %v848_v26 = vadd.f32 %v847_v24, %v1549_v31  ;;  %v896_v27 = vpop.f32.mrf.mxu3 }
 0x165   :  { %v752_v29 = vpop.f32.mrf.mxu0 }
 0x166   :  { %v897_v44 = vadd.f32 %v896_v27, %v848_v26  ;;  %v753_v46 = vadd.f32 %v752_v29, %v1546_v28  ;;  %v801_v30 = vpop.f32.mrf.mxu1 }
 0x168   :  { %v935_v33 = vmax.f32 %v897_v44, 0.0  ;;  %v802_v34 = vadd.f32 %v801_v30, %v753_v46 }
 0x16a   :  { %v1573_v35 = vpack.c.bf16 %v935_v33, %v933_v32  ;;  %v936_v47 = vmax.f32 %v802_v34, 0.0 }
 0x16b   :  { %v850_v36 = vpop.f32.mrf.mxu2 }
 0x16c   :  { %v851_v37 = vadd.f32 %v850_v36, %v1549_v31  ;;  %v899_v38 = vpop.f32.mrf.mxu3 }
 0x16d   :  { %v754_v39 = vpop.f32.mrf.mxu0 }
 0x16e   :  { %v900_v40 = vadd.f32 %v899_v38, %v851_v37  ;;  %v755_v41 = vadd.f32 %v754_v39, %v1546_v28  ;;  %v803_v42 = vpop.f32.mrf.mxu1 }
 0x170   :  { %v804_v45 = vadd.f32 %v803_v42, %v755_v41  ;;  %v937_v58 = vmax.f32 %v900_v40, 0.0 }
 0x172   :  { %v938_v48 = vmax.f32 %v804_v45, 0.0 }
 0x173   :  { %v852_v49 = vpop.f32.mrf.mxu2 }
 0x174   :  { %v1577_v50 = vpack.c.bf16 %v938_v48, %v936_v47  ;;  %v853_v51 = vadd.f32 %v852_v49, %v1549_v31  ;;  %v901_v52 = vpop.f32.mrf.mxu3 }
 0x175   :  { %v757_v53 = vpop.f32.mrf.mxu0 }
 0x176   :  { %v902_v54 = vadd.f32 %v901_v52, %v853_v51  ;;  %v758_v56 = vadd.f32 %v757_v53, %v1546_v28  ;;  %v806_v57 = vpop.f32.mrf.mxu1 }
 0x178   :  { %v939_v59 = vmax.f32 %v902_v54, 0.0  ;;  %v807_v60 = vadd.f32 %v806_v57, %v758_v56 }
 0x17a   :  { %v1581_v61 = vpack.c.bf16 %v939_v59, %v937_v58  ;;  %v940_v7 = vmax.f32 %v807_v60, 0.0 }
 0x17b   :  { %v855_v62 = vpop.f32.mrf.mxu2 }
 0x17c   :  { %v856_v63 = vadd.f32 %v855_v62, %v1549_v31  ;;  %v904_v0 = vpop.f32.mrf.mxu3 }
 0x17d   :  { %v759_v1 = vpop.f32.mrf.mxu0 }
 0x17e   :  { %v905_v2 = vadd.f32 %v904_v0, %v856_v63  ;;  %v760_v4 = vadd.f32 %v759_v1, %v1546_v28  ;;  %v808_v5 = vpop.f32.mrf.mxu1 }
 0x180   :  { %v809_v6 = vadd.f32 %v808_v5, %v760_v4  ;;  %v941_v17 = vmax.f32 %v905_v2, 0.0 }
 0x182   :  { %v942_v8 = vmax.f32 %v809_v6, 0.0 }
 0x183   :  { %v857_v9 = vpop.f32.mrf.mxu2 }
 0x184   :  { %v1585_v10 = vpack.c.bf16 %v942_v8, %v940_v7  ;;  %v858_v11 = vadd.f32 %v857_v9, %v1549_v31  ;;  %v906_v12 = vpop.f32.mrf.mxu3 }
 0x185   :  { %v762_v14 = vpop.f32.mrf.mxu0 }
 0x186   :  { %v907_v15 = vadd.f32 %v906_v12, %v858_v11  ;;  %v811_v16 = vpop.f32.mrf.mxu1  ;;  %v763_v8 = vadd.f32 %v762_v14, %v1546_v28 }
 0x188   :  { %v943_v18 = vmax.f32 %v907_v15, 0.0 }
 0x18a   :  { %v1588_v19 = vpack.c.bf16 %v943_v18, %v941_v17 }
 0x18b   :  { %v860_v20 = vpop.f32.mrf.mxu2 }
 0x18c   :  { %v909_v21 = vpop.f32.mrf.mxu3 }
 0x18d   :  { %v764_v22 = vpop.f32.mrf.mxu0 }
 0x18e   :  { %v813_v23 = vpop.f32.mrf.mxu1  ;;  %v765_v2 = vadd.f32 %v764_v22, %v1546_v28  ;;  %v861_v22 = vadd.f32 %v860_v20, %v1549_v31 }
 0x190   :  { %v814_v15 = vadd.f32 %v813_v23, %v765_v2 }
 0x193   :  { %v862_v24 = vpop.f32.mrf.mxu2 }
 0x194   :  { %v911_v26 = vpop.f32.mrf.mxu3 }
 0x195   :  { %v767_v27 = vpop.f32.mrf.mxu0 }
 0x196   :  { %v816_v29 = vpop.f32.mrf.mxu1  ;;  %v768_v52 = vadd.f32 %v767_v27, %v1546_v28  ;;  %v812_v27 = vadd.f32 %v811_v16, %v763_v8  ;;  %v197_v16 = vld [vmem:[%s1628_s7] sm:$0x3] }
 0x197   :  { %974 = vst [vmem:[#allocation1] ss:$9 sm:$0xff] %v197_v16 }
 0x198   :  { %v817_v63 = vadd.f32 %v816_v29, %v768_v52  ;;  %v863_v29 = vadd.f32 %v862_v24, %v1549_v31 }
 0x19a   :  { %v948_v9 = vmax.f32 %v817_v63, 0.0 }
 0x19b   :  { %v865_v44 = vpop.f32.mrf.mxu2 }
 0x19c   :  { %v914_v46 = vpop.f32.mrf.mxu3  ;;  %v866_v4 = vadd.f32 %v865_v44, %v1549_v31  ;;  %v946_v44 = vmax.f32 %v814_v15, 0.0 }
 0x19d   :  { %v769_v30 = vpop.f32.mrf.mxu0 }
 0x19e   :  { %v818_v32 = vpop.f32.mrf.mxu1  ;;  %v770_v48 = vadd.f32 %v769_v30, %v1546_v28  ;;  %v915_v17 = vadd.f32 %v914_v46, %v866_v4 }
 0x1a0   :  { %v819_v57 = vadd.f32 %v818_v32, %v770_v48  ;;  %v949_v32 = vmax.f32 %v915_v17, 0.0 }
 0x1a2   :  { %v950_v5 = vmax.f32 %v819_v57, 0.0 }
 0x1a3   :  { %v867_v33 = vpop.f32.mrf.mxu2 }
 0x1a4   :  { %v916_v34 = vpop.f32.mrf.mxu3  ;;  %v868_v0 = vadd.f32 %v867_v33, %v1549_v31  ;;  %v968_v18 = vpack.c.bf16 %v950_v5, %v948_v9  ;;  %v944_v33 = vmax.f32 %v812_v27, 0.0 }
 0x1a5   :  { %v772_v36 = vpop.f32.mrf.mxu0 }
 0x1a6   :  { %v821_v37 = vpop.f32.mrf.mxu1  ;;  %v773_v38 = vadd.f32 %v772_v36, %v1546_v28  ;;  %v917_v11 = vadd.f32 %v916_v34, %v868_v0  ;;  %v912_v36 = vadd.f32 %v911_v26, %v863_v29  ;;  %v966_v14 = vpack.c.bf16 %v946_v44, %v944_v33 }
 0x1a8   :  { %v822_v42 = vadd.f32 %v821_v37, %v773_v38  ;;  %v951_v30 = vmax.f32 %v917_v11, 0.0  ;;  %v947_v34 = vmax.f32 %v912_v36, 0.0 }
 0x1aa   :  { %v952_v53 = vmax.f32 %v822_v42, 0.0  ;;  %v969_v37 = vpack.c.bf16 %v951_v30, %v949_v32 }
 0x1ab   :  { %v870_v39 = vpop.f32.mrf.mxu2 }
 0x1ac   :  { %v919_v40 = vpop.f32.mrf.mxu3  ;;  %v871_v49 = vadd.f32 %v870_v39, %v1549_v31 }
 0x1ad   :  { %v774_v41 = vpop.f32.mrf.mxu0 }
 0x1ae   :  { %v775_v45 = vadd.f32 %v774_v41, %v1546_v28  ;;  %v823_v47 = vpop.f32.mrf.mxu1  ;;  %v920_v58 = vadd.f32 %v919_v40, %v871_v49  ;;  %v910_v28 = vadd.f32 %v909_v21, %v861_v22 }
 0x1b0   :  { %v824_v51 = vadd.f32 %v823_v47, %v775_v45  ;;  %v953_v6 = vmax.f32 %v920_v58, 0.0  ;;  %v945_v23 = vmax.f32 %v910_v28, 0.0 }
 0x1b2   :  { %v954_v54 = vmax.f32 %v824_v51, 0.0  ;;  %v967_v46 = vpack.c.bf16 %v947_v34, %v945_v23 }
 0x1b3   :  { %v872_v56 = vpop.f32.mrf.mxu2 }
 0x1b4   :  { %v970_v59 = vpack.c.bf16 %v954_v54, %v952_v53  ;;  %v873_v60 = vadd.f32 %v872_v56, %v1549_v31  ;;  %v921_v62 = vpop.f32.mrf.mxu3  ;;  %v975_v31 = vld [vmem:[#allocation1] sm:$0xff] }
 0x1b6   :  { %v922_v1 = vadd.f32 %v921_v62, %v873_v60  ;;  %979 = vmatpush.bf16.xpose.msra.mxu0 %v970_v59 }
 0x1b8   :  { %v955_v7 = vmax.f32 %v922_v1, 0.0 }
 0x1ba   :  { %v971_v12 = vpack.c.bf16 %v955_v7, %v953_v6 }
 0x1bc   :  { %992 = vmatpush.bf16.xpose.msra.mxu1 %v971_v12 }
 0x1be   :  { %980 = vmatpush.bf16.xpose.msra.mxu0 %v968_v18 }
 0x1c4   :  { %993 = vmatpush.bf16.xpose.msra.mxu1 %v969_v37 }
 0x1c6   :  { %981 = vmatpush.bf16.xpose.msra.mxu0 %v966_v14 }
 0x1cc   :  { %994 = vmatpush.bf16.xpose.msra.mxu1 %v967_v46 }
 0x1ce   :  { %982 = vmatpush.bf16.xpose.msra.mxu0 %v1585_v10  ;;  %v976_v10 = vld [vmem:[#allocation1 + $0x9] sm:$0xff] }
 0x1d4   :  { %995 = vmatpush.bf16.xpose.msra.mxu1 %v1588_v19 }
 0x1d6   :  { %983 = vmatpush.bf16.xpose.msra.mxu0 %v1577_v50  ;;  %v972_v50 = vstv %s1629_s8 }
 0x1dc   :  { %996 = vmatpush.bf16.xpose.msra.mxu1 %v1581_v61 }
 0x1de   :  { %984 = vmatpush.bf16.xpose.msra.mxu0 %v1569_v25 }
 0x1e4   :  { %997 = vmatpush.bf16.xpose.msra.mxu1 %v1573_v35 }
 0x1e6   :  { %985 = vmatpush.bf16.xpose.msra.mxu0 %v1561_v3 }
 0x1ec   :  { %998 = vmatpush.bf16.xpose.msra.mxu1 %v1565_v13 }
 0x1ee   :  { %986 = vmatpush.bf16.xpose.msra.mxu0 %v1553_v43 }
 0x1f4   :  { %999 = vmatpush.bf16.xpose.msra.mxu1 %v1557_v55 }
 0x1f5   :  { %987 = vmatmul.bf16.vlgmr.msra.gmra.mxu0 %v975_v31 }
 0x1fb   :  { %1000 = vmatmul.bf16.vlgmr.msra.gmra.mxu1 %v976_v10 }
 0x272   :  { %v988_v61 = vpop.f32.mrf.mxu0 }
 0x273   :  { %v989_v25 = vadd.f32 %v988_v61, %v972_v50 }
 0x278   :  { %v1001_v3 = vpop.f32.mrf.mxu1 }
 0x279   :  { %v1002_v43 = vadd.f32 %v1001_v3, %v989_v25 }
 0x27a   :  { %v990_v55 = vpop.f32.mrf.mxu0 }
 0x27b   :  { %1005 = vst [vmem:[#allocation12] sm:$0x1] %v1002_v43 }
 0x27c   :  { %1016 = dma.vmem_to_hbm [thread:$0]  %s1012_s16, 16, %s1014_s19, [#allocation5]  }
 0x280   :  { %v1003_v13 = vpop.f32.mrf.mxu1 }
 0x281   :  { %1385 = dma.done.wait [#allocation5], 16  }
 0x282   :  { %1386 = vsyncadd [#allocation5], 4294967280 }
 0x283   :  { %1021 = vsyncpa [#allocation4], 1 }
 0x284   :  { %1022 = vsyncpa [#allocation7], 1 }
 0x285   :  { %1023 = vsyncpa [#allocation10], 1 }
 0x286   :  { %1024 = vsyncpa [#allocation5], 1 }

</bundles_post_ra>
